<compile_context>
chip_gen: v7x
topology: tpu7x:2x2x1
jax: 0.10.0
libtpu: 0.0.40
codegen_flags: <defaults>
</compile_context>

<pallas_src>
import jax
import jax.numpy as jnp
from jax import lax
from jax.experimental import pallas as pl
from jax.experimental.pallas import tpu as pltpu

MARGIN = 0.3


def _triplet_kernel(x_ref, tcol_ref, trow_ref, loss_ref, correct_ref, gram_acc):
    k = pl.program_id(0)

    @pl.when(k == 0)
    def _init():
        gram_acc[...] = jnp.zeros_like(gram_acc)

    # (N, tk) slab in its native dtype (bf16 stays bf16 for the MXU).
    x = x_ref[...]

    # Gram accumulation: contract dim 1 of both operands -> the MXU consumes
    # the RHS in transposed form directly, no (D, N) copy through the XLU.
    gram_acc[...] += lax.dot_general(
        x, x,
        dimension_numbers=(((1,), (1,)), ((), ())),
        preferred_element_type=jnp.float32,
    )

    @pl.when(k == pl.num_programs(0) - 1)
    def _epilogue():
        gram = gram_acc[...]                              # (N, N) f32
        n = gram.shape[0]

        # ||x_i||^2 recovered from the Gram diagonal (one-shot N^2 masked
        # reduce; replaces the per-step streamed squared-norm accumulator).
        rows = lax.broadcasted_iota(jnp.int32, (n, n), 0)
        cols = lax.broadcasted_iota(jnp.int32, (n, n), 1)
        diag = jnp.where(rows == cols, gram, 0.0)
        sq_col = jnp.sum(diag, axis=1, keepdims=True)     # (N, 1)
        sq_row = jnp.sum(diag, axis=0, keepdims=True)     # (1, N)

        # Squared pairwise distances (clamped like PyTorch's clamp(min=1e-12)).
        d2 = jnp.maximum(sq_col + sq_row - 2.0 * gram, 1e-12)

        # Same-label mask without any in-kernel label transpose.
        mask = tcol_ref[...] == trow_ref[...]             # (N, N) bool

        neg_inf = jnp.float32(-jnp.inf)
        pos_inf = jnp.float32(jnp.inf)
        # Hard mining on squared distances (sqrt is monotone -> exact).
        ap2 = jnp.max(jnp.where(mask, d2, neg_inf), axis=1, keepdims=True)
        an2 = jnp.min(jnp.where(mask, pos_inf, d2), axis=1, keepdims=True)

        dist_ap = jnp.sqrt(ap2)                           # only 2*N sqrts total
        dist_an = jnp.sqrt(an2)

        # MarginRankingLoss(margin)(dist_an, dist_ap, y=1), reduction='mean'.
        per_sample = jnp.maximum(dist_ap - dist_an + MARGIN, 0.0)
        loss_ref[0] = jnp.sum(per_sample) / jnp.float32(n)
        correct_ref[0] = jnp.sum((dist_an >= dist_ap).astype(jnp.int32))


def _pick_tk(n, d, itemsize, budget_bytes=4 * 1024 * 1024):
    """Largest lane-aligned D tile whose double-buffered block stays under a
    few MiB, without padding D much beyond its 128-aligned size.

    Returns (tk, d_padded) with d_padded a multiple of tk (zero-pad in wrapper).
    """
    d128 = -(-d // 128) * 128
    slack = d128 // 8  # allow <=12.5% extra padding to earn a bigger tile
    for cand in (4096, 2048, 1024, 512, 256, 128):
        if 2 * n * cand * itemsize > budget_bytes:
            continue
        padded = -(-d // cand) * cand
        if padded - d128 <= slack:
            return cand, padded
    # Fallback (huge N or tiny D): minimal lane-aligned tile.
    return 128, d128


def ori_triplet_loss(inputs, targets):
    """inputs: (N, D) float features; targets: (N,) integer labels.

    Returns (loss: f32 scalar, correct: int32 scalar), matching
    OriTripletLoss.forward (margin=0.3, mean reduction).
    """
    n, d = inputs.shape
    itemsize = jnp.dtype(inputs.dtype).itemsize
    tk, d_pad = _pick_tk(n, d, itemsize)
    if d_pad != d:
        # Zero padding is exact: contributes nothing to Gram or norms.
        inputs = jnp.pad(inputs, ((0, 0), (0, d_pad - d)))
    grid_k = d_pad // tk

    t_col = targets.reshape(n, 1).astype(jnp.int32)
    t_row = targets.reshape(1, n).astype(jnp.int32)

    cost = pl.CostEstimate(
        flops=2 * n * n * d_pad,
        transcendentals=2 * n,
        bytes_accessed=n * d_pad * itemsize + 2 * n * 4 + 8,
    )

    # VMEM budget: double-buffered x tile + gram accumulator + a few (N,N)
    # epilogue temporaries. Clamp to the real chip capacity minus headroom so
    # the request stays legal on v7x (64 MiB per-TC VMEM) as well as v5e/v6e.
    vmem_bytes = 2 * n * tk * itemsize + 6 * n * n * 4 + (1 << 20)
    try:
        vmem_cap = int(pltpu.get_tpu_info().vmem_capacity_bytes)
    except Exception:
        vmem_cap = 64 * 1024 * 1024  # conservative: v7x per-TC VMEM
    vmem_limit = int(min(max(vmem_bytes, 32 * 1024 * 1024),
                         vmem_cap - 8 * 1024 * 1024))

    loss, correct = pl.pallas_call(
        _triplet_kernel,
        grid=(grid_k,),
        out_shape=(
            jax.ShapeDtypeStruct((1,), jnp.float32),
            jax.ShapeDtypeStruct((1,), jnp.int32),
        ),
        in_specs=[
            # Feature slab, pipelined (double-buffered) over the D axis.
            # TODO(synk): if a profile shows exposed DMA between grid steps,
            # raise depth with pipeline_mode=pl.Buffered(3).
            pl.BlockSpec((n, tk), lambda k: (0, k)),
            pl.BlockSpec((n, 1), lambda k: (0, 0)),    # labels, column orientation
            pl.BlockSpec((1, n), lambda k: (0, 0)),    # labels, row orientation
        ],
        out_specs=(
            pl.BlockSpec(memory_space=pltpu.SMEM),
            pl.BlockSpec(memory_space=pltpu.SMEM),
        ),
        scratch_shapes=[
            pltpu.VMEM((n, n), jnp.float32),  # gram accumulator
        ],
        compiler_params=pltpu.CompilerParams(
            dimension_semantics=("arbitrary",),        # reduction axis
            vmem_limit_bytes=vmem_limit,
        ),
        cost_estimate=cost,
    )(inputs, t_col, t_row)
    # TODO(synk): for very large N (epilogue (N,N) temporaries nearing v7x's
    # 64 MiB) tile the epilogue over row strips, and/or add a leading
    # "parallel" row-block grid axis so v7x's 2 TCs split MXU-bound work;
    # omitted here — at typical re-ID batch sizes this kernel is HBM-bound.
    return loss[0], correct[0]


if __name__ == "__main__":
    key = jax.random.PRNGKey(0)
    # D deliberately not a multiple of 128 so the wrapper-side zero-padding and
    # the multi-step D-accumulation grid are both exercised.
    n, d = 8, 1100
    feats = jax.random.normal(key, (n, d), dtype=jnp.float32)
    labels = jnp.array([0, 0, 1, 1, 2, 2, 3, 3], dtype=jnp.int32)

    loss, correct = ori_triplet_loss(feats, labels)
    jax.block_until_ready((loss, correct))

    # Pure-JAX reference (mirrors the PyTorch forward).
    sq = jnp.sum(feats * feats, axis=1, keepdims=True)
    dist = jnp.sqrt(jnp.maximum(sq + sq.T - 2.0 * feats @ feats.T, 1e-12))
    mask = labels[:, None] == labels[None, :]
    dap = jnp.max(jnp.where(mask, dist, -jnp.inf), axis=1)
    dan = jnp.min(jnp.where(mask, jnp.inf, dist), axis=1)
    ref_loss = jnp.mean(jnp.maximum(dap - dan + MARGIN, 0.0))
    ref_correct = jnp.sum((dan >= dap).astype(jnp.int32))

    assert jnp.allclose(loss, ref_loss, rtol=1e-4, atol=1e-4), (loss, ref_loss)
    assert int(correct) == int(ref_correct), (correct, ref_correct)
    print("KERNEL_OK")
</pallas_src>

<mosaic_0001>
module attributes {stable_mosaic.version = 11 : i64} {
  func.func @_triplet_kernel(%arg0: i32, %arg1: memref<8x256xf32, #tpu.memory_space<vmem>>, %arg2: memref<8x1xi32, #tpu.memory_space<vmem>>, %arg3: memref<1x8xi32, #tpu.memory_space<vmem>>, %arg4: memref<1xf32, #tpu.memory_space<smem>>, %arg5: memref<1xi32, #tpu.memory_space<smem>>, %arg6: memref<8x8xf32, #tpu.memory_space<vmem>>) attributes {dimension_semantics = [#tpu.dimension_semantics<arbitrary>], iteration_bounds = array<i64: 5>, scalar_prefetch = 0 : i64, scratch_operands = 1 : i64, tpu.core_type = #tpu.core_type<tc>, window_params = [{transform_indices = @transform_0, window_bounds = array<i64: 8, 256>}, {pipeline_mode = #tpu.pipeline_mode<synchronous>, transform_indices = @transform_1, window_bounds = array<i64: 8, 1>}, {pipeline_mode = #tpu.pipeline_mode<synchronous>, transform_indices = @transform_2, window_bounds = array<i64: 1, 8>}, {transform_indices = @transform_3, window_bounds = array<i64: 1>}, {transform_indices = @transform_4, window_bounds = array<i64: 1>}]} {
    %c0_i32 = arith.constant 0 : i32
    %0 = arith.cmpi eq, %arg0, %c0_i32 : i32
    %1 = arith.extui %0 : i1 to i32
    %c0_i32_0 = arith.constant 0 : i32
    %2 = arith.cmpi ne, %1, %c0_i32_0 : i32
    scf.if %2 {
      %cst_7 = arith.constant 0.000000e+00 : f32
      %11 = vector.broadcast %cst_7 : f32 to vector<8x8xf32>
      %c0_8 = arith.constant 0 : index
      %c0_9 = arith.constant 0 : index
      %12 = vector.load %arg6[%c0_8, %c0_9] : memref<8x8xf32, #tpu.memory_space<vmem>>, vector<8x8xf32>
      tpu.vector_store %arg6[%c0_8, %c0_9], %11 {strides = array<i32>} : memref<8x8xf32, #tpu.memory_space<vmem>>, vector<8x8xf32>,
    } else {
    }
    %c0 = arith.constant 0 : index
    %c0_1 = arith.constant 0 : index
    %3 = vector.load %arg1[%c0, %c0_1] : memref<8x256xf32, #tpu.memory_space<vmem>>, vector<8x256xf32>
    %c0_2 = arith.constant 0 : index
    %c0_3 = arith.constant 0 : index
    %4 = vector.load %arg6[%c0_2, %c0_3] : memref<8x8xf32, #tpu.memory_space<vmem>>, vector<8x8xf32>
    %cst = arith.constant dense<0.000000e+00> : vector<8x8xf32>
    %5 = tpu.matmul %3, %3, %cst {dimension_numbers = #tpu.dot_dimension_numbers<[1], [1], [0], [0], [0, 0, 1, 0], [], []>} : vector<8x256xf32>, vector<8x256xf32>, vector<8x8xf32> -> vector<8x8xf32>
    %6 = arith.addf %4, %5 : vector<8x8xf32>
    %c0_4 = arith.constant 0 : index
    %c0_5 = arith.constant 0 : index
    %7 = vector.load %arg6[%c0_4, %c0_5] : memref<8x8xf32, #tpu.memory_space<vmem>>, vector<8x8xf32>
    tpu.vector_store %arg6[%c0_4, %c0_5], %6 {strides = array<i32>} : memref<8x8xf32, #tpu.memory_space<vmem>>, vector<8x8xf32>,
    %c4_i32 = arith.constant 4 : i32
    %8 = arith.cmpi eq, %arg0, %c4_i32 : i32
    %9 = arith.extui %8 : i1 to i32
    %c0_i32_6 = arith.constant 0 : i32
    %10 = arith.cmpi ne, %9, %c0_i32_6 : i32
    scf.if %10 {
      %c0_7 = arith.constant 0 : index
      %c0_8 = arith.constant 0 : index
      %11 = vector.load %arg6[%c0_7, %c0_8] : memref<8x8xf32, #tpu.memory_space<vmem>>, vector<8x8xf32>
      %12 = tpu.iota {dimensions = array<i32: 0>} : vector<8x8xi32>
      %13 = tpu.iota {dimensions = array<i32: 1>} : vector<8x8xi32>
      %14 = arith.cmpi eq, %12, %13 : vector<8x8xi32>
      %cst_9 = arith.constant 0.000000e+00 : f32
      %15 = vector.broadcast %cst_9 : f32 to vector<8x8xf32>
      %16 = arith.select %14, %11, %15 : vector<8x8xi1>, vector<8x8xf32>
      %cst_10 = arith.constant dense<0.000000e+00> : vector<8xf32>
      %17 = vector.multi_reduction <add>, %16, %cst_10 [1] : vector<8x8xf32> to vector<8xf32>
      %18 = vector.shape_cast %17 : vector<8xf32> to vector<8x1xf32>
      %cst_11 = arith.constant dense<0.000000e+00> : vector<8xf32>
      %19 = vector.multi_reduction <add>, %16, %cst_11 [0] : vector<8x8xf32> to vector<8xf32>
      %20 = vector.shape_cast %19 : vector<8xf32> to vector<1x8xf32>
      %21 = vector.broadcast %18 : vector<8x1xf32> to vector<8x8xf32>
      %22 = vector.broadcast %20 : vector<1x8xf32> to vector<8x8xf32>
      %23 = arith.addf %21, %22 : vector<8x8xf32>
      %cst_12 = arith.constant 2.000000e+00 : f32
      %24 = vector.broadcast %cst_12 : f32 to vector<8x8xf32>
      %25 = arith.mulf %24, %11 : vector<8x8xf32>
      %26 = arith.subf %23, %25 : vector<8x8xf32>
      %cst_13 = arith.constant 9.99999996E-13 : f32
      %27 = vector.broadcast %cst_13 : f32 to vector<8x8xf32>
      %28 = arith.maximumf %26, %27 : vector<8x8xf32>
      %c0_14 = arith.constant 0 : index
      %c0_15 = arith.constant 0 : index
      %29 = vector.load %arg2[%c0_14, %c0_15] : memref<8x1xi32, #tpu.memory_space<vmem>>, vector<8x1xi32>
      %c0_16 = arith.constant 0 : index
      %c0_17 = arith.constant 0 : index
      %30 = vector.load %arg3[%c0_16, %c0_17] : memref<1x8xi32, #tpu.memory_space<vmem>>, vector<1x8xi32>
      %31 = vector.broadcast %29 : vector<8x1xi32> to vector<8x8xi32>
      %32 = vector.broadcast %30 : vector<1x8xi32> to vector<8x8xi32>
      %33 = arith.cmpi eq, %31, %32 : vector<8x8xi32>
      %cst_18 = arith.constant 0xFF800000 : f32
      %34 = vector.broadcast %cst_18 : f32 to vector<8x8xf32>
      %35 = arith.select %33, %28, %34 : vector<8x8xi1>, vector<8x8xf32>
      %cst_19 = arith.constant dense<0xFF800000> : vector<8xf32>
      %36 = vector.multi_reduction <maximumf>, %35, %cst_19 [1] : vector<8x8xf32> to vector<8xf32>
      %37 = vector.shape_cast %36 : vector<8xf32> to vector<8x1xf32>
      %cst_20 = arith.constant 0x7F800000 : f32
      %38 = vector.broadcast %cst_20 : f32 to vector<8x8xf32>
      %39 = arith.select %33, %38, %28 : vector<8x8xi1>, vector<8x8xf32>
      %cst_21 = arith.constant dense<0x7F800000> : vector<8xf32>
      %40 = vector.multi_reduction <minimumf>, %39, %cst_21 [1] : vector<8x8xf32> to vector<8xf32>
      %41 = vector.shape_cast %40 : vector<8xf32> to vector<8x1xf32>
      %42 = math.sqrt %37 : vector<8x1xf32>
      %43 = math.sqrt %41 : vector<8x1xf32>
      %44 = arith.subf %42, %43 : vector<8x1xf32>
      %cst_22 = arith.constant 3.000000e-01 : f32
      %45 = vector.broadcast %cst_22 : f32 to vector<8x1xf32>
      %46 = arith.addf %44, %45 : vector<8x1xf32>
      %cst_23 = arith.constant 0.000000e+00 : f32
      %47 = vector.broadcast %cst_23 : f32 to vector<8x1xf32>
      %48 = arith.maximumf %46, %47 : vector<8x1xf32>
      %49 = vector.shape_cast %48 : vector<8x1xf32> to vector<1x8x1xf32>
      %cst_24 = arith.constant dense<0.000000e+00> : vector<1xf32>
      %50 = vector.multi_reduction <add>, %49, %cst_24 [1, 2] : vector<1x8x1xf32> to vector<1xf32>
      %51 = vector.shape_cast %50 : vector<1xf32> to vector<1x1x1xf32>
      %52 = vector.extract %51[0, 0, 0] : f32 from vector<1x1x1xf32>
      %cst_25 = arith.constant 8.000000e+00 : f32
      %53 = arith.divf %52, %cst_25 : f32
      %c0_26 = arith.constant 0 : index
      %54 = memref.load %arg4[%c0_26] : memref<1xf32, #tpu.memory_space<smem>>
      memref.store %53, %arg4[%c0_26] : memref<1xf32, #tpu.memory_space<smem>>
      %55 = arith.cmpf oge, %43, %42 : vector<8x1xf32>
      %56 = arith.extui %55 : vector<8x1xi1> to vector<8x1xi32>
      %57 = vector.shape_cast %56 : vector<8x1xi32> to vector<1x8x1xi32>
      %cst_27 = arith.constant dense<0> : vector<1xi32>
      %58 = vector.multi_reduction <add>, %57, %cst_27 [1, 2] : vector<1x8x1xi32> to vector<1xi32>
      %59 = vector.shape_cast %58 : vector<1xi32> to vector<1x1x1xi32>
      %60 = vector.extract %59[0, 0, 0] : i32 from vector<1x1x1xi32>
      %c0_28 = arith.constant 0 : index
      %61 = memref.load %arg5[%c0_28] : memref<1xi32, #tpu.memory_space<smem>>
      memref.store %60, %arg5[%c0_28] : memref<1xi32, #tpu.memory_space<smem>>
    } else {
    }
    return
  }
  func.func @transform_0(%arg0: i32) -> (i32, i32) {
    %c0_i32 = arith.constant 0 : i32
    %c0_i32_0 = arith.constant 0 : i32
    return %c0_i32, %arg0 : i32, i32
  }
  func.func @transform_1(%arg0: i32) -> (i32, i32) {
    %c0_i32 = arith.constant 0 : i32
    %c0_i32_0 = arith.constant 0 : i32
    %c0_i32_1 = arith.constant 0 : i32
    return %c0_i32, %c0_i32_0 : i32, i32
  }
  func.func @transform_2(%arg0: i32) -> (i32, i32) {
    %c0_i32 = arith.constant 0 : i32
    %c0_i32_0 = arith.constant 0 : i32
    %c0_i32_1 = arith.constant 0 : i32
    return %c0_i32, %c0_i32_0 : i32, i32
  }
  func.func @transform_3(%arg0: i32) -> i32 {
    %c0_i32 = arith.constant 0 : i32
    %c0_i32_0 = arith.constant 0 : i32
    return %c0_i32 : i32
  }
  func.func @transform_4(%arg0: i32) -> i32 {
    %c0_i32 = arith.constant 0 : i32
    %c0_i32_0 = arith.constant 0 : i32
    return %c0_i32 : i32
  }
}

</mosaic_0001>

<bundles_post_ra>
// kernel: tpu_custom_call.1
= control target key start
LH: loop header
LB: loop body
LE: loop exit
PB: predicated region body
PF: predicated region fallthrough
CT: control target
= control target key end

     0   :  { %10 = vsyncpa [#allocation4], 0  ;;  %s811_s0 = inlined_call_operand.hbm [shape: f32[8,1280], index: 0, kind: input, shape index: {}]   ;;  %s812_s1 = inlined_call_operand.vmem [shape: s32[8,1], index: 1, kind: input, shape index: {}]   ;;  %s813_s2 = inlined_call_operand.vmem [shape: s32[1,8], index: 2, kind: input, shape index: {}]   ;;  %s814_s3 = inlined_call_operand.hbm [shape: f32[1], index: 3, kind: output, shape index: {0}]   ;;  %s815_s4 = inlined_call_operand.hbm [shape: s32[1], index: 4, kind: output, shape index: {1}]  }
   0x1   :  { %12 = vsyncpa [#allocation4 + $0x1], 0 }
   0x2   :  { %13 = vsyncpa [#allocation5], 0 }
   0x3   :  { %14 = vsyncpa [#allocation8], 0  ;;  %s656_s15 = smov 0   ;;  %s658_s16 = smov 0  }
   0x4   :  { %s660_s17 = smov 0   ;;  %s662_s18 = smov 0  }
   0x5 LB: > { %s675_s19 = sadd.s32 4294967295, %s624_s18   ;;  %s678_s20 = sadd.s32 1, %s624_s18   ;;  %s624_s18 = sphi %s662_s18, %s823_s18   ;;  %s620_s17 = sphi %s660_s17, %s822_s17   ;;  %s616_s16 = sphi %s658_s16, %s821_s16   ;;  %s612_s15 = sphi %s656_s15, %s820_s15  }
   0x6   : > { %s24_s21 = ssub.s32 %s624_s18, %s678_s20  ;;  %s27_s22 = sadd.s32 1, %s620_s17 }
   0x7   : > { %p25_p0 = scmp.eq.s32.totalorder %s24_s21, 0  ;;  %p34_p1 = scmp.ne.s32.totalorder %s620_s17, %s616_s16 }
   0x8   : > { %p35_p2 = scmp.eq.s32.totalorder %s624_s18, 0  ;;  %p40_p3 = scmp.ne.s32.totalorder %s616_s16, %s612_s15 }
   0x9   : > { %s688_s23 = scalar_select %p25_p0, %s620_s17, %s27_s22  }
   0xa   : > { %p36_p4 = por %p35_p2, %p34_p1  ;;  %p41_p5 = scmp.eq.s32.totalorder %s675_s19, 0 }
   0xb   : > { %p482_p6 = scmp.lt.s32.totalorder %s624_s18, 5  ;;  %s154_s25 = sand.u32 1, %s620_s17  }
   0xc   : > { %p692_p7 = por %p41_p5, %p40_p3  ;;  %s449_s26 = sshll.u32 %s154_s25, 4 }
   0xd   : > { %s463_s27 = sshll.u32 %s624_s18, 8  ;;  %s158_s5 = scalar_lea.vmem [#allocation3], %s449_s26 }
   0xe   : > { %s701_s30 = scalar_lea.hbm %s811_s0, %s463_s27  ;;  %s166_s6 = sshll.u32 %s158_s5, 4  ;;  %s703_s6 = int_to_ptr.vmem [resolvable:$true] %s166_s6 }
   0xf   : > { %p705_p8 = pnand %p482_p6, %p36_p4  ;;  %s155_s8 = scalar_lea.sflag [#allocation4], %s154_s25 }
  0x10   : > { %s528_s9 = scalar_lea.hbm %s701_s30, 256  ;;  %s533_s12 = scalar_lea.hbm %s811_s0, 1280 }
  0x11   : > { %p529_p11 = scmp.ne.s32.totalorder %s701_s30, %s528_s9  ;;  %p530_p12 = pneg %p705_p8 }
  0x12   : > { %p534_p1 = scmp.lt.u32.totalorder %s701_s30, %s811_s0  ;;  %p535_p2 = scmp.lt.u32.totalorder %s533_s12, %s528_s9 }
  0x13   : > { %p531_p13 = pnand %p530_p12, %p529_p11  ;;  %p537_p4 = scmp.lt.u32.totalorder %s528_s9, %s701_s30 }
  0x14   : > { %p536_p3 = por %p535_p2, %p534_p1 }
  0x15   : > { %p532_p0 = pneg %p531_p13 }
  0x16   : > { %p538_p5 = por %p537_p4, %p536_p3 }
  0x18   : > { %p539_p6 = pnand %p538_p5, %p532_p0 }
  0x1a   : > { %542 = shalt.err (!%p539_p6)
}
  0x1b   : > { %s543_s15 = scalar_lea.vmem %s703_s6, 256  ;;  %s626_s21 = smov [#allocation3]  }
  0x1c   : > { %p544_p11 = scmp.ne.s32.totalorder %s703_s6, %s543_s15  ;;  %s548_s22 = sshll.u32 %s626_s21, 4  ;;  %s549_s22 = int_to_ptr.vmem [resolvable:$false] %s548_s22 }
  0x1d   : > { %s550_s25 = scalar_lea.vmem %s549_s22, 512  ;;  %p551_p10 = scmp.lt.s32.totalorder %s703_s6, %s549_s22 }
  0x1e   : > { %p546_p13 = pnand %p544_p11, %p530_p12  ;;  %p552_p1 = scmp.lt.s32.totalorder %s550_s25, %s543_s15 }
  0x20   : > { %p547_p9 = pneg %p546_p13  ;;  %p553_p2 = por %p552_p1, %p551_p10 }
  0x22   : > { %p554_p3 = pnand %p553_p2, %p547_p9 }
  0x24   : > { %557 = shalt.err (!%p554_p3)
}
  0x25   : > { %481 = dma.hbm_to_vmem [thread:$0]  (!%p705_p8), %s701_s30, 256, %s703_s6, %s155_s8  }
  0x26   : > { %p818_p0 = scmp.lt.s32.totalorder %s624_s18, 6  ;;  %p819_p4 = scmp.ge.s32.totalorder %s624_s18, 1 }
  0x28   : > { %p172_p12 = pnand %p819_p4, %p818_p0 }
  0x29   : > { %s177_s26 = sand.u32 (!%p172_p12), 1, %s616_s16  }
  0x2a   : > { %175 = sbr.rel (%p172_p12) target bundleno = 844 (0x34c), region = 32  ;;  %s453_s27 = sshll.u32 (!%p172_p12), %s177_s26, 4 }
  0x2b   : > { %s178_s28 = scalar_lea.sflag (!%p172_p12), [#allocation4], %s177_s26  ;;  %s181_s29 = scalar_lea.vmem (!%p172_p12), [#allocation3], %s453_s27 }
  0x31   : > { %599 = dma.done.wait (%p692_p7), %s178_s28, 256  }
  0x32   : > { %601 = vsyncadd (%p692_p7), %s178_s28, 4294967040  ;;  %p454_p9 = scmp.ne.s32.totalorder %s675_s19, 0 }
  0x33   : > { %vm206_vm0 = vcmask (!%p454_p9), 64512   ;;  %v627_v0 = vmov (!%p454_p9), 0.0  }
  0x34   : > { %205 = sbr.rel (%p454_p9) target bundleno = 59 (0x3b), region = 40  ;;  %207 = vst.msk [vmem:[#allocation2] sm:$0xff] (!%p454_p9), %vm206_vm0, %v627_v0 }
  0x3b PF: > { %v209_v1 = vld [vmem:[%s181_s29 + $0x8] sm:$0xff]  ;;  %v208_v2 = vld [vmem:[%s181_s29] sm:$0xff]  ;;  %vm282_vm1 = vcmask 64512   ;;  %p455_p7 = scmp.ne.s32.totalorder %s675_s19, 4 }
  0x3c   : > { %211 = vmatprep.subr.mxu0 %v209_v1  ;;  %275 = vmatprep.mubr.f32.mxu0 %v209_v1  ;;  %v210_v3 = vld [vmem:[#allocation2] sm:$0xff]  ;;  %v289_v7 = vlaneseq (!%p455_p7)  ;;  %v628_v8 = vmov (!%p455_p7), 0   ;;  %vm343_vm9 = vcmask (!%p455_p7), 7168  }
  0x3d   : > { %212 = vmatpush1.xpose.msra.mxu0 %v208_v2  ;;  %523 = vset.pattern.permute.xlu0 (!%p455_p7), %v628_v8  ;;  %v308_v14 = vld [vmem:[%s812_s1] sm:$0xff] (!%p455_p7) }
  0x3e   : > { %v290_v10 = vshrl.u32 (!%p455_p7), %v289_v7, 7  ;;  %v292_v11 = vand.u32 (!%p455_p7), 127, %v289_v7  ;;  %v456_v25 = vld [vmem:[%s813_s2] ss:$0 sm:$0xff] (!%p455_p7) }
  0x40   : > { %276 = vmatmul.mubr.f32.vlgmr.msra.gmra.mrb[0].mxu0 %v208_v2  ;;  %vm293_vm2 = vcmp.eq.s32.totalorder (!%p455_p7), %v290_v10, %v292_v11 }
 0x110   : > { %287 = sbr.rel (%p455_p7) target bundleno = 816 (0x330), region = 44 }
 0x113   : > { %v277_v4 = vpop.f32.mrb[0].mxu0 }
 0x114   : > { %v281_v5 = vadd.f32 %v277_v4, %v210_v3  ;;  %v279_v6 = vpop.f32.mrb[1].mxu0 }
 0x116   : > { %283 = vst.msk [vmem:[#allocation2] sm:$0xff] %vm282_vm1, %v281_v5 }
 0x11d   : > { %v288_v9 = vld [vmem:[#allocation2] sm:$0xff] }
 0x11e   : > { %v294_v12 = vsel %vm293_vm2, %v288_v9, 0.0  ;;  %v305_v21 = vmul.f32 2.0, %v288_v9 }
 0x11f   : > { %v295_v13 = vsel %vm282_vm1, %v294_v12, 0.0 }
 0x120   : > { %296 = vadd.xlane.f32.xlu0 %v295_v13  ;;  %v298_v15 = vrot.slane %v295_v13, 4 }
 0x122   : > { %v299_v16 = vadd.f32 %v298_v15, %v295_v13 }
 0x124   : > { %v300_v17 = vrot.slane %v299_v16, 2 }
 0x126   : > { %v301_v18 = vadd.f32 %v300_v17, %v299_v16 }
 0x128   : > { %v302_v19 = vrot.slane %v301_v18, 1 }
 0x12a   : > { %v303_v20 = vadd.f32 %v302_v19, %v301_v18 }
 0x136   : > { %311 = vperm.xlu0 %523, %v308_v14  }
 0x1ad   : > { %v297_v22 = vpop.xlane.xlu0 %296 }
 0x1ae   : > { %v304_v23 = vadd.f32 %v303_v20, %v297_v22 }
 0x1b0   : > { %v306_v24 = vsub.f32 %v304_v23, %v305_v21 }
 0x1b2   : > { %v307_v27 = vmax.f32 %v306_v24, 1e-12 }
 0x1b5   : > { %v312_v26 = vpop.permute.xlu0 %311 }
 0x1b6   : > { %vm317_vm3 = vcmp.eq.s32.totalorder %v312_v26, %v456_v25 }
 0x1b7   : > { %v318_v28 = vsel %vm317_vm3, %v307_v27, -inf  ;;  %v322_v30 = vsel %vm317_vm3, inf, %v307_v27 }
 0x1b8   : > { %v319_v29 = vsel %vm282_vm1, %v318_v28, -inf  ;;  %v323_v31 = vsel %vm282_vm1, %v322_v30, inf }
 0x1b9   : > { %320 = vmax.xlane.f32.xlu1 %v319_v29 }
 0x1bd   : > { %324 = vmin.xlane.f32.xlu1 %v323_v31 }
 0x246   : > { %v321_v32 = vpop.xlane.xlu1 %320 }
 0x247   : > { %524 = vrsqrt.f32 %v321_v32  ;;  %vm328_vm4 = vcmp.eq.f32.partialorder %v321_v32, inf  ;;  %v331_v39 = vand.u32 2147483648, %v321_v32  ;;  %vm330_vm6 = vcmp.eq.f32.partialorder %v321_v32, 0.0 }
 0x24a   : > { %v325_v33 = vpop.xlane.xlu1 %324 }
 0x24b   : > { %526 = vrsqrt.f32 %v325_v33  ;;  %vm335_vm5 = vcmp.eq.f32.partialorder %v325_v33, inf  ;;  %v338_v40 = vand.u32 2147483648, %v325_v33  ;;  %vm337_vm7 = vcmp.eq.f32.partialorder %v325_v33, 0.0 }
 0x251   : > { %v525_v34 = vpop.eup %524 }
 0x252   : > { %v327_v35 = vmul.f32 %v525_v34, %v321_v32 }
 0x254   : > { %v329_v37 = vsel %vm328_vm4, %v321_v32, %v327_v35 }
 0x255   : > { %v527_v36 = vpop.eup %526  ;;  %v332_v42 = vsel %vm330_vm6, %v331_v39, %v329_v37 }
 0x256   : > { %v334_v38 = vmul.f32 %v527_v36, %v325_v33 }
 0x258   : > { %v336_v41 = vsel %vm335_vm5, %v325_v33, %v334_v38 }
 0x259   : > { %v339_v43 = vsel %vm337_vm7, %v338_v40, %v336_v41 }
 0x25a   : > { %v340_v44 = vsub.f32 %v332_v42, %v339_v43  ;;  %vm359_vm8 = vcmp.ge.f32.partialorder %v339_v43, %v332_v42 }
 0x25b   : > { %v360_v48 = vsel %vm359_vm8, 1, %v628_v8 }
 0x25c   : > { %v341_v45 = vadd.f32 0.3, %v340_v44  ;;  %v361_v49 = vrot.slane %v360_v48, 4 }
 0x25e   : > { %v342_v46 = vmax.f32 %v341_v45, 0.0  ;;  %v362_v50 = vadd.s32 %v361_v49, %v360_v48 }
 0x260   : > { %v344_v47 = vsel %vm343_vm9, %v342_v46, 0.0  ;;  %v363_v52 = vrot.slane %v362_v50, 2 }
 0x261   : > { %345 = vadd.xlane.f32.xlu1 %v344_v47 }
 0x262   : > { %v364_v55 = vadd.s32 %v363_v52, %v362_v50 }
 0x264   : > { %v365_v58 = vrot.slane %v364_v55, 1 }
 0x266   : > { %v366_v61 = vadd.s32 %v365_v58, %v364_v55 }
 0x2ee   : > { %v346_v51 = vpop.xlane.xlu1 %345 }
 0x2ef   : > { %v347_v53 = vrot.slane %v346_v51, 4 }
 0x2f1   : > { %v348_v54 = vadd.f32 %v347_v53, %v346_v51 }
 0x2f3   : > { %v349_v56 = vrot.slane %v348_v54, 2 }
 0x2f5   : > { %v350_v57 = vadd.f32 %v349_v56, %v348_v54 }
 0x2f7   : > { %v351_v59 = vrot.slane %v350_v57, 1 }
 0x2f9   : > { %v352_v60 = vadd.f32 %v351_v59, %v350_v57 }
 0x2fb   : > { %464 = vpush %v352_v60 }
 0x2fc   : > { %466 = vpush %v366_v61 }
 0x32c   : > { %s465_s6 = spop %464 }
 0x32d   : > { %s356_s7 = smul.f32 0.125, %s465_s6  ;;  %s467_s8 = spop %466 }
 0x32e   : > { %369 = sst [smem:[#allocation7]] %s467_s8 }
 0x32f   : > { %358 = sst [smem:[#allocation6]] %s356_s7 }
 0x330 PF: > { %p483_p8 = scmp.eq.s32.totalorder %s675_s19, 4  ;;  %s558_s11 = scalar_lea.hbm %s814_s3, 16 }
 0x331   : > { %p559_p10 = scmp.ne.s32.totalorder %s814_s3, %s558_s11  ;;  %p564_p11 = scmp.lt.u32.totalorder %s558_s11, %s814_s3 }
 0x333   : > { %p560_p5 = pnand %p559_p10, %p483_p8 }
 0x335   : > { %p561_p6 = pneg %p560_p5 }
 0x337   : > { %p566_p13 = pnand %p564_p11, %p561_p6 }
 0x339   : > { %569 = shalt.err (!%p566_p13)
}
 0x33a   : > { %s629_s21 = smov [#allocation6]   ;;  %s570_s28 = scalar_lea.hbm %s815_s4, 16 }
 0x33b   : > { %471 = dma.smem_to_hbm (%p483_p8), %s629_s21, 16, %s814_s3, [#allocation5]  }
 0x33c   : > { %p571_p1 = scmp.ne.s32.totalorder %s815_s4, %s570_s28  ;;  %p576_p0 = scmp.lt.u32.totalorder %s570_s28, %s815_s4 }
 0x33e   : > { %p572_p2 = pnand %p571_p1, %p483_p8 }
 0x340   : > { %p573_p3 = pneg %p572_p2 }
 0x342   : > { %p578_p4 = pnand %p576_p0, %p573_p3 }
 0x344   : > { %581 = shalt.err (!%p578_p4)
}
 0x345   : > { %s630_s5 = smov [#allocation7]  }
 0x346   : > { %473 = dma.smem_to_hbm (%p483_p8), %s630_s5, 16, %s815_s4, [#allocation8]  }
 0x347   : > { %603 = dma.done.wait (%p483_p8), [#allocation5], 16  }
 0x348   : > { %605 = vsyncadd (%p483_p8), [#allocation5], 4294967280 }
 0x349   : > { %607 = dma.done.wait (%p483_p8), [#allocation8], 16  }
 0x34a   : > { %609 = vsyncadd (%p483_p8), [#allocation8], 4294967280 }
 0x34b   : > { %396 = sfence }
 0x34c PF: > { %p17_p12 = scmp.ge.s32.totalorder %s678_s20, 7   ;;  %s820_s15 = smov %s616_s16 }
 0x34d   : > { %s821_s16 = smov %s620_s17  ;;  %s822_s17 = smov %s688_s23 }
 0x34e   : > { %s823_s18 = smov %s678_s20  ;;  %19 = sbr.rel (!%p17_p12) target bundleno = 5 (0x5), region = 87 }
 0x355   :  { %402 = vsyncpa [#allocation4], 1 }
 0x356   :  { %404 = vsyncpa [#allocation4 + $0x1], 1 }
 0x357   :  { %405 = vsyncpa [#allocation5], 1 }
 0x358   :  { %407 = vsyncpa [#allocation5 + $0x1], 1 }
 0x359   :  { %408 = vsyncpa [#allocation8], 1 }

</bundles_post_ra>
